<compile_context>
chip_gen: v7x
topology: tpu7x:2x2x1
jax: 0.10.0
libtpu: 0.0.40
codegen_flags: <defaults>
</compile_context>

<pallas_src>
import functools

import jax
import jax.numpy as jnp
from jax.experimental import pallas as pl
from jax.experimental.pallas import tpu as pltpu


def _make_mlp_kernel(num_hidden_layers: int):
    """Kernel: (Linear -> ReLU) * num_hidden_layers -> Linear(out_features=1).

    Ref order: (c1, c2, *kernel_params, out), where kernel_params is
      num_hidden_layers >= 1:
        [W0a (D,h0), W0b (D,h0), b0 (1,h0),
         W1 (h0,h1), b1 (1,h1), ...,
         Wlast_row (1, h_last), blast (1,1)]
      num_hidden_layers == 0:
        [Wa_row (1,D), Wb_row (1,D), b (1,1)]
    """

    def kernel(*refs):
        c1_ref, c2_ref = refs[0], refs[1]
        o_ref = refs[-1]
        p = refs[2:-1]

        if num_hidden_layers == 0:
            # Single Linear(2D -> 1): pure VPU multiply + lane reduce.
            wa, wb, b = p[0][...], p[1][...], p[2][...]
            out = (jnp.sum(c1_ref[...] * wa, axis=-1, keepdims=True)
                   + jnp.sum(c2_ref[...] * wb, axis=-1, keepdims=True)
                   + b)
        else:
            # First hidden layer: split-W0 fuses the concat into two matmuls.
            w0a, w0b, b0 = p[0][...], p[1][...], p[2][...]
            h = (jnp.dot(c1_ref[...], w0a, preferred_element_type=jnp.float32)
                 + jnp.dot(c2_ref[...], w0b, preferred_element_type=jnp.float32)
                 + b0)
            h = jnp.maximum(h, 0.0)

            idx = 3
            for _ in range(1, num_hidden_layers):
                w, b = p[idx][...], p[idx + 1][...]
                idx += 2
                h = jnp.maximum(
                    jnp.dot(h, w, preferred_element_type=jnp.float32) + b, 0.0)

            # Final (out_features == 1) projection: VPU mul + lane reduce
            # instead of a 1-lane-wide MXU pass.
            w_last, b_last = p[idx][...], p[idx + 1][...]   # (1, prev), (1, 1)
            out = jnp.sum(h * w_last, axis=-1, keepdims=True) + b_last

        o_ref[...] = out.astype(o_ref.dtype)

    return kernel


def init_params(key, input_size, hidden_sizes):
    """PyTorch-style uniform(+-1/sqrt(fan_in)) init, standard layout:
    [w0 (2D,h0), b0 (1,h0), w1 (h0,h1), b1, ..., wL (h_last,1), bL (1,1)]."""
    params = []
    in_size = 2 * input_size
    for out_size in list(hidden_sizes) + [1]:
        key, kw, kb = jax.random.split(key, 3)
        bound = 1.0 / (in_size ** 0.5)
        w = jax.random.uniform(kw, (in_size, out_size), jnp.float32, -bound, bound)
        b = jax.random.uniform(kb, (1, out_size), jnp.float32, -bound, bound)
        params.extend([w, b])
        in_size = out_size
    return params


def prepare_kernel_params(params, input_size, num_hidden_layers):
    """Convert standard params to kernel layout: split W0, row-major W_last."""
    if num_hidden_layers == 0:
        w, b = params
        return [w[:input_size].T, w[input_size:].T, b]
    w0, b0 = params[0], params[1]
    kp = [w0[:input_size], w0[input_size:], b0]
    kp.extend(params[2:-2])
    kp.append(params[-2].T)   # (prev, 1) -> (1, prev)
    kp.append(params[-1])     # (1, 1)
    return kp


@functools.partial(jax.jit, static_argnames=("num_hidden_layers", "block_b"))
def sequence_position_classifier_fwd(clip1, clip2, kernel_params, *,
                                     num_hidden_layers, block_b=512):
    # squeeze(1) is a pure reshape (no HBM copy); the concat is fused in-kernel.
    c1 = jnp.squeeze(clip1, axis=1)
    c2 = jnp.squeeze(clip2, axis=1)
    B, D = c1.shape

    # Full batch in one tile if small, otherwise a multiple-of-8 batch tile.
    tb = B if B <= block_b else block_b
    grid = (pl.cdiv(B, tb),)

    act_spec = pl.BlockSpec((tb, D), lambda i: (i, 0))
    out_spec = pl.BlockSpec((tb, 1), lambda i: (i, 0))
    # Weights/biases: same (0, 0) block every grid step -> resident in VMEM.
    param_specs = [pl.BlockSpec(p.shape, lambda i: (0, 0)) for p in kernel_params]

    n_param_elems = sum(int(p.size) for p in kernel_params)
    cost = pl.CostEstimate(
        flops=2 * B * n_param_elems,
        transcendentals=0,
        bytes_accessed=4 * (int(c1.size) + int(c2.size) + B + n_param_elems),
    )

    kernel = _make_mlp_kernel(num_hidden_layers)
    return pl.pallas_call(
        kernel,
        out_shape=jax.ShapeDtypeStruct((B, 1), jnp.float32),
        grid=grid,
        in_specs=[act_spec, act_spec] + param_specs,
        out_specs=out_spec,
        compiler_params=pltpu.CompilerParams(
            dimension_semantics=("parallel",)),
        cost_estimate=cost,
    )(c1, c2, *kernel_params)


def reference_fwd(clip1, clip2, params, num_hidden_layers):
    h = jnp.concatenate([jnp.squeeze(clip1, 1), jnp.squeeze(clip2, 1)], axis=1)
    for li in range(num_hidden_layers + 1):
        w, b = params[2 * li], params[2 * li + 1]
        h = h @ w + b
        if li < num_hidden_layers:
            h = jnp.maximum(h, 0.0)
    return h


if __name__ == "__main__":
    # Small shapes consistent with the module: clip1, clip2: (batch, 1, input_size)
    batch = 2
    input_size = 16
    hidden_sizes = [32, 32]   # dropout=0.0 -> no dropout layers (eval semantics)
    nhl = len(hidden_sizes)

    key = jax.random.PRNGKey(0)
    k1, k2, kp = jax.random.split(key, 3)
    clip1 = jax.random.normal(k1, (batch, 1, input_size), jnp.float32)
    clip2 = jax.random.normal(k2, (batch, 1, input_size), jnp.float32)
    params = init_params(kp, input_size, hidden_sizes)
    kparams = prepare_kernel_params(params, input_size, nhl)

    out = sequence_position_classifier_fwd(clip1, clip2, kparams,
                                           num_hidden_layers=nhl)
    out = jax.block_until_ready(out)
    ref = reference_fwd(clip1, clip2, params, nhl)
    assert out.shape == (batch, 1), out.shape
    assert jnp.allclose(out, ref, atol=1e-5, rtol=1e-5), (out, ref)

    # Also exercise the batch grid path (multiple tiles, resident weights,
    # "parallel" axis -> megacore sharding on v7x).
    bb = 64
    kb1, kb2 = jax.random.split(jax.random.PRNGKey(1))
    big1 = jax.random.normal(kb1, (bb, 1, input_size), jnp.float32)
    big2 = jax.random.normal(kb2, (bb, 1, input_size), jnp.float32)
    out_big = sequence_position_classifier_fwd(big1, big2, kparams,
                                               num_hidden_layers=nhl,
                                               block_b=16)
    out_big = jax.block_until_ready(out_big)
    ref_big = reference_fwd(big1, big2, params, nhl)
    assert out_big.shape == (bb, 1)
    assert jnp.allclose(out_big, ref_big, atol=1e-5, rtol=1e-5)

    print("KERNEL_OK")
</pallas_src>

<mosaic_0001>
module attributes {stable_mosaic.version = 11 : i64} {
  func.func @kernel(%arg0: i32, %arg1: memref<2x16xf32, #tpu.memory_space<vmem>>, %arg2: memref<2x16xf32, #tpu.memory_space<vmem>>, %arg3: memref<16x32xf32, #tpu.memory_space<vmem>>, %arg4: memref<16x32xf32, #tpu.memory_space<vmem>>, %arg5: memref<1x32xf32, #tpu.memory_space<vmem>>, %arg6: memref<32x32xf32, #tpu.memory_space<vmem>>, %arg7: memref<1x32xf32, #tpu.memory_space<vmem>>, %arg8: memref<1x32xf32, #tpu.memory_space<vmem>>, %arg9: memref<1x1xf32, #tpu.memory_space<vmem>>, %arg10: memref<2x1xf32, #tpu.memory_space<vmem>>) attributes {dimension_semantics = [#tpu.dimension_semantics<parallel>], iteration_bounds = array<i64: 1>, scalar_prefetch = 0 : i64, scratch_operands = 0 : i64, tpu.core_type = #tpu.core_type<tc>, window_params = [{transform_indices = @transform_0, window_bounds = array<i64: 2, 16>}, {transform_indices = @transform_1, window_bounds = array<i64: 2, 16>}, {pipeline_mode = #tpu.pipeline_mode<synchronous>, transform_indices = @transform_2, window_bounds = array<i64: 16, 32>}, {pipeline_mode = #tpu.pipeline_mode<synchronous>, transform_indices = @transform_3, window_bounds = array<i64: 16, 32>}, {pipeline_mode = #tpu.pipeline_mode<synchronous>, transform_indices = @transform_4, window_bounds = array<i64: 1, 32>}, {pipeline_mode = #tpu.pipeline_mode<synchronous>, transform_indices = @transform_5, window_bounds = array<i64: 32, 32>}, {pipeline_mode = #tpu.pipeline_mode<synchronous>, transform_indices = @transform_6, window_bounds = array<i64: 1, 32>}, {pipeline_mode = #tpu.pipeline_mode<synchronous>, transform_indices = @transform_7, window_bounds = array<i64: 1, 32>}, {pipeline_mode = #tpu.pipeline_mode<synchronous>, transform_indices = @transform_8, window_bounds = array<i64: 1, 1>}, {transform_indices = @transform_9, window_bounds = array<i64: 2, 1>}]} {
    %c0 = arith.constant 0 : index
    %c0_0 = arith.constant 0 : index
    %0 = vector.load %arg3[%c0, %c0_0] : memref<16x32xf32, #tpu.memory_space<vmem>>, vector<16x32xf32>
    %c0_1 = arith.constant 0 : index
    %c0_2 = arith.constant 0 : index
    %1 = vector.load %arg4[%c0_1, %c0_2] : memref<16x32xf32, #tpu.memory_space<vmem>>, vector<16x32xf32>
    %c0_3 = arith.constant 0 : index
    %c0_4 = arith.constant 0 : index
    %2 = vector.load %arg5[%c0_3, %c0_4] : memref<1x32xf32, #tpu.memory_space<vmem>>, vector<1x32xf32>
    %c0_5 = arith.constant 0 : index
    %c0_6 = arith.constant 0 : index
    %3 = vector.load %arg1[%c0_5, %c0_6] : memref<2x16xf32, #tpu.memory_space<vmem>>, vector<2x16xf32>
    %cst = arith.constant dense<0.000000e+00> : vector<2x32xf32>
    %4 = tpu.matmul %3, %0, %cst {dimension_numbers = #tpu.dot_dimension_numbers<[1], [0], [0], [1], [0, 0, 1, 1], [], []>} : vector<2x16xf32>, vector<16x32xf32>, vector<2x32xf32> -> vector<2x32xf32>
    %c0_7 = arith.constant 0 : index
    %c0_8 = arith.constant 0 : index
    %5 = vector.load %arg2[%c0_7, %c0_8] : memref<2x16xf32, #tpu.memory_space<vmem>>, vector<2x16xf32>
    %cst_9 = arith.constant dense<0.000000e+00> : vector<2x32xf32>
    %6 = tpu.matmul %5, %1, %cst_9 {dimension_numbers = #tpu.dot_dimension_numbers<[1], [0], [0], [1], [0, 0, 1, 1], [], []>} : vector<2x16xf32>, vector<16x32xf32>, vector<2x32xf32> -> vector<2x32xf32>
    %7 = arith.addf %4, %6 : vector<2x32xf32>
    %8 = vector.broadcast %2 : vector<1x32xf32> to vector<2x32xf32>
    %9 = arith.addf %7, %8 : vector<2x32xf32>
    %cst_10 = arith.constant 0.000000e+00 : f32
    %10 = vector.broadcast %cst_10 : f32 to vector<2x32xf32>
    %11 = arith.maximumf %9, %10 : vector<2x32xf32>
    %c0_11 = arith.constant 0 : index
    %c0_12 = arith.constant 0 : index
    %12 = vector.load %arg6[%c0_11, %c0_12] : memref<32x32xf32, #tpu.memory_space<vmem>>, vector<32x32xf32>
    %c0_13 = arith.constant 0 : index
    %c0_14 = arith.constant 0 : index
    %13 = vector.load %arg7[%c0_13, %c0_14] : memref<1x32xf32, #tpu.memory_space<vmem>>, vector<1x32xf32>
    %cst_15 = arith.constant dense<0.000000e+00> : vector<2x32xf32>
    %14 = tpu.matmul %11, %12, %cst_15 {dimension_numbers = #tpu.dot_dimension_numbers<[1], [0], [0], [1], [0, 0, 1, 1], [], []>} : vector<2x32xf32>, vector<32x32xf32>, vector<2x32xf32> -> vector<2x32xf32>
    %15 = vector.broadcast %13 : vector<1x32xf32> to vector<2x32xf32>
    %16 = arith.addf %14, %15 : vector<2x32xf32>
    %cst_16 = arith.constant 0.000000e+00 : f32
    %17 = vector.broadcast %cst_16 : f32 to vector<2x32xf32>
    %18 = arith.maximumf %16, %17 : vector<2x32xf32>
    %c0_17 = arith.constant 0 : index
    %c0_18 = arith.constant 0 : index
    %19 = vector.load %arg8[%c0_17, %c0_18] : memref<1x32xf32, #tpu.memory_space<vmem>>, vector<1x32xf32>
    %c0_19 = arith.constant 0 : index
    %c0_20 = arith.constant 0 : index
    %20 = vector.load %arg9[%c0_19, %c0_20] : memref<1x1xf32, #tpu.memory_space<vmem>>, vector<1x1xf32>
    %21 = vector.broadcast %19 : vector<1x32xf32> to vector<2x32xf32>
    %22 = arith.mulf %18, %21 : vector<2x32xf32>
    %cst_21 = arith.constant dense<0.000000e+00> : vector<2xf32>
    %23 = vector.multi_reduction <add>, %22, %cst_21 [1] : vector<2x32xf32> to vector<2xf32>
    %24 = vector.shape_cast %23 : vector<2xf32> to vector<2x1xf32>
    %25 = vector.broadcast %20 : vector<1x1xf32> to vector<2x1xf32>
    %26 = arith.addf %24, %25 : vector<2x1xf32>
    %c0_22 = arith.constant 0 : index
    %c0_23 = arith.constant 0 : index
    %27 = vector.load %arg10[%c0_22, %c0_23] : memref<2x1xf32, #tpu.memory_space<vmem>>, vector<2x1xf32>
    tpu.vector_store %arg10[%c0_22, %c0_23], %26 {strides = array<i32>} : memref<2x1xf32, #tpu.memory_space<vmem>>, vector<2x1xf32>,
    return
  }
  func.func @transform_0(%arg0: i32) -> (i32, i32) {
    %c0_i32 = arith.constant 0 : i32
    %c0_i32_0 = arith.constant 0 : i32
    return %arg0, %c0_i32 : i32, i32
  }
  func.func @transform_1(%arg0: i32) -> (i32, i32) {
    %c0_i32 = arith.constant 0 : i32
    %c0_i32_0 = arith.constant 0 : i32
    return %arg0, %c0_i32 : i32, i32
  }
  func.func @transform_2(%arg0: i32) -> (i32, i32) {
    %c0_i32 = arith.constant 0 : i32
    %c0_i32_0 = arith.constant 0 : i32
    %c0_i32_1 = arith.constant 0 : i32
    return %c0_i32, %c0_i32_0 : i32, i32
  }
  func.func @transform_3(%arg0: i32) -> (i32, i32) {
    %c0_i32 = arith.constant 0 : i32
    %c0_i32_0 = arith.constant 0 : i32
    %c0_i32_1 = arith.constant 0 : i32
    return %c0_i32, %c0_i32_0 : i32, i32
  }
  func.func @transform_4(%arg0: i32) -> (i32, i32) {
    %c0_i32 = arith.constant 0 : i32
    %c0_i32_0 = arith.constant 0 : i32
    %c0_i32_1 = arith.constant 0 : i32
    return %c0_i32, %c0_i32_0 : i32, i32
  }
  func.func @transform_5(%arg0: i32) -> (i32, i32) {
    %c0_i32 = arith.constant 0 : i32
    %c0_i32_0 = arith.constant 0 : i32
    %c0_i32_1 = arith.constant 0 : i32
    return %c0_i32, %c0_i32_0 : i32, i32
  }
  func.func @transform_6(%arg0: i32) -> (i32, i32) {
    %c0_i32 = arith.constant 0 : i32
    %c0_i32_0 = arith.constant 0 : i32
    %c0_i32_1 = arith.constant 0 : i32
    return %c0_i32, %c0_i32_0 : i32, i32
  }
  func.func @transform_7(%arg0: i32) -> (i32, i32) {
    %c0_i32 = arith.constant 0 : i32
    %c0_i32_0 = arith.constant 0 : i32
    %c0_i32_1 = arith.constant 0 : i32
    return %c0_i32, %c0_i32_0 : i32, i32
  }
  func.func @transform_8(%arg0: i32) -> (i32, i32) {
    %c0_i32 = arith.constant 0 : i32
    %c0_i32_0 = arith.constant 0 : i32
    %c0_i32_1 = arith.constant 0 : i32
    return %c0_i32, %c0_i32_0 : i32, i32
  }
  func.func @transform_9(%arg0: i32) -> (i32, i32) {
    %c0_i32 = arith.constant 0 : i32
    %c0_i32_0 = arith.constant 0 : i32
    return %arg0, %c0_i32 : i32, i32
  }
}

</mosaic_0001>

<bundles_post_ra>
// kernel: sequence_position_classifier_fwd.1
= control target key start
LH: loop header
LB: loop body
LE: loop exit
PB: predicated region body
PF: predicated region fallthrough
CT: control target
= control target key end

     0   :  { %s609_s0 = inlined_call_operand.vmem [shape: f32[2,16], index: 0, kind: input, shape index: {}]   ;;  %s610_s1 = inlined_call_operand.hbm [shape: f32[2,16], index: 1, kind: input, shape index: {}]   ;;  %s611_s2 = inlined_call_operand.vmem [shape: f32[16,32], index: 2, kind: input, shape index: {}]   ;;  %s612_s3 = inlined_call_operand.hbm [shape: f32[16,32], index: 3, kind: input, shape index: {}]   ;;  %s613_s4 = inlined_call_operand.vmem [shape: f32[1,32], index: 4, kind: input, shape index: {}]   ;;  %s614_s5 = inlined_call_operand.hbm [shape: f32[32,32], index: 5, kind: input, shape index: {}]   ;;  %s615_s6 = inlined_call_operand.vmem [shape: f32[1,32], index: 6, kind: input, shape index: {}]   ;;  %s616_s7 = inlined_call_operand.vmem [shape: f32[1,32], index: 7, kind: input, shape index: {}]   ;;  %s617_s8 = inlined_call_operand.<no memory space> [shape: f32[1,1], index: 8, kind: input, shape index: {}]   ;;  %s618_s9 = inlined_call_operand.vmem [shape: f32[2,1], index: 9, kind: output, shape index: {}]  }
   0x1   :  { %v14_v0 = vstv %s617_s8 }
   0x2   :  { %15 = vst [vmem:[#allocation2] sm:$0x1] %v14_v0 }
   0x3   :  { %16 = vsyncpa [#allocation4], 0 }
   0x4   :  { %17 = vsyncpa [#allocation6], 0  ;;  %s482_s11 = smov [#allocation5]   ;;  %s412_s15 = scalar_lea.hbm %s612_s3, 256 }
   0x5   :  { %s37_s12 = sshll.u32 %s482_s11, 4  ;;  %p413_p0 = scmp.ne.s32.totalorder %s612_s3, %s412_s15  ;;  %s38_s12 = int_to_ptr.vmem [resolvable:$true] %s37_s12 }
   0x6   :  { %p416_p1 = scmp.lt.u32.totalorder %s412_s15, %s612_s3 }
   0x8   :  { %p418_p2 = pnand %p416_p1, %p413_p0 }
   0xa   :  { %421 = shalt.err (!%p418_p2)
}
   0xb   :  { %s422_s8 = scalar_lea.vmem %s38_s12, 256  ;;  %p427_p4 = scmp.lt.s32.totalorder %s38_s12, %s38_s12 }
   0xc   :  { %p423_p3 = scmp.ne.s32.totalorder %s38_s12, %s422_s8  ;;  %p428_p5 = scmp.lt.s32.totalorder %s422_s8, %s422_s8 }
   0xe   :  { %p429_p6 = por %p428_p5, %p427_p4 }
  0x10   :  { %p430_p7 = pnand %p429_p6, %p423_p3 }
  0x12   :  { %433 = shalt.err (!%p430_p7)
}
  0x13   :  { %s483_s20 = smov 128   ;;  %s484_s21 = smov 8  }
  0x14   :  { %43 = dma.hbm_to_vmem [thread:$0]  %s612_s3, 256, %s38_s12, [#allocation6], %s483_s20, %s483_s20, %s484_s21  }
  0x15   :  { %s485_s24 = smov [#allocation3]   ;;  %s486_s26 = smov [#allocation7]  }
  0x16   :  { %s26_s25 = sshll.u32 %s485_s24, 4  ;;  %s51_s27 = sshll.u32 %s486_s26, 4  ;;  %s27_s25 = int_to_ptr.vmem [resolvable:$true] %s26_s25  ;;  %s52_s27 = int_to_ptr.vmem [resolvable:$true] %s51_s27 }
  0x17   :  { %s434_s30 = scalar_lea.hbm %s610_s1, 32 }
  0x18   :  { %p435_p8 = scmp.ne.s32.totalorder %s610_s1, %s434_s30  ;;  %p438_p9 = scmp.lt.u32.totalorder %s434_s30, %s610_s1 }
  0x1a   :  { %p440_p10 = pnand %p438_p9, %p435_p8 }
  0x1c   :  { %443 = shalt.err (!%p440_p10)
}
  0x1d   :  { %s444_s3 = scalar_lea.vmem %s27_s25, 32  ;;  %p449_p12 = scmp.lt.s32.totalorder %s27_s25, %s27_s25 }
  0x1e   :  { %p445_p11 = scmp.ne.s32.totalorder %s27_s25, %s444_s3  ;;  %p450_p13 = scmp.lt.s32.totalorder %s444_s3, %s444_s3 }
  0x20   :  { %p451_p0 = por %p450_p13, %p449_p12 }
  0x22   :  { %p452_p1 = pnand %p451_p0, %p445_p11 }
  0x24   :  { %455 = shalt.err (!%p452_p1)
}
  0x25   :  { %29 = dma.hbm_to_vmem [thread:$0]  %s610_s1, 32, %s27_s25, [#allocation4]  }
  0x26   :  { %s456_s18 = scalar_lea.hbm %s614_s5, 512 }
  0x27   :  { %p457_p2 = scmp.ne.s32.totalorder %s614_s5, %s456_s18  ;;  %p460_p3 = scmp.lt.u32.totalorder %s456_s18, %s614_s5 }
  0x29   :  { %p462_p4 = pnand %p460_p3, %p457_p2 }
  0x2b   :  { %465 = shalt.err (!%p462_p4)
}
  0x2c   :  { %s466_s24 = scalar_lea.vmem %s52_s27, 512  ;;  %p471_p6 = scmp.lt.s32.totalorder %s52_s27, %s52_s27 }
  0x2d   :  { %p467_p5 = scmp.ne.s32.totalorder %s52_s27, %s466_s24  ;;  %p472_p7 = scmp.lt.s32.totalorder %s466_s24, %s466_s24 }
  0x2f   :  { %p473_p8 = por %p472_p7, %p471_p6 }
  0x31   :  { %p474_p9 = pnand %p473_p8, %p467_p5 }
  0x33   :  { %477 = shalt.err (!%p474_p9)
}
  0x34   :  { %57 = dma.hbm_to_vmem [thread:$0]  %s614_s5, 512, %s52_s27, [#allocation6], %s483_s20, %s483_s20, %s484_s21  }
  0x35   :  { %478 = dma.done.wait [#allocation4], 32  }
  0x36   :  { %479 = vsyncadd [#allocation4], 4294967264 }
  0x37   :  { %480 = dma.done.wait [#allocation6], 768  }
  0x38   :  { %481 = vsyncadd [#allocation6], 4294966528  ;;  %v487_v1 = vmov 0.0|0.0   ;;  %vm488_vm0 = vmmov 0   ;;  %v489_v2 = vmov 0.0   ;;  %v75_v3 = vld [vmem:[#allocation5] sm:$0xff] }
  0x39   :  { %392 = vmatprep.subr.bf16.mxu1 %v487_v1  ;;  %371 = vmatprep.mubr.msk.f32.mxu1 %vm488_vm0, %v489_v2  ;;  %v76_v4 = vld [vmem:[#allocation5 + $0x8] sm:$0xff]  ;;  %v73_v6 = vld [vmem:[%s611_s2] sm:$0xff]  ;;  %vm80_vm1 = vcmask 130048   ;;  %v235_v11 = vld [vmem:[#allocation7] sm:$0xff]  ;;  %vm246_vm2 = vcmask 261120   ;;  %vm330_vm3 = vcmask 254976  }
  0x3a   :  { %398 = vmatprep.subr.bf16.mxu0 %v487_v1  ;;  %389 = vmatprep.mubr.msk.f32.mxu0 %vm488_vm0, %v489_v2  ;;  %v393_v5 = vpack.c.bf16 %v76_v4, %v75_v3  ;;  %v74_v7 = vld [vmem:[%s611_s2 + $0x8] sm:$0xff]  ;;  %v79_v8 = vld [vmem:[#allocation3] sm:$0x3]  ;;  %v351_v19 = vld [vmem:[%s613_s4] ss:$0 sm:$0xff]  ;;  %vm341_vm4 = vcmask 1024  }
  0x3b   :  { %v396_v9 = vpack.c.bf16 %v74_v7, %v73_v6  ;;  %v78_v10 = vld [vmem:[%s609_s0] sm:$0x3]  ;;  %v237_v14 = vld [vmem:[#allocation7 + $0x10] sm:$0xff]  ;;  %v238_v15 = vld [vmem:[#allocation7 + $0x18] sm:$0xff] }
  0x3c   :  { %394 = vmatpush3.bf16.msra.mxu1 %v393_v5  ;;  %v236_v12 = vld [vmem:[#allocation7 + $0x8] sm:$0xff]  ;;  %v402_v16 = vpack.c.bf16 %v238_v15, %v237_v14 }
  0x3d   :  { %395 = vmatprep.subr.bf16.mxu1 %v487_v1  ;;  %v399_v13 = vpack.c.bf16 %v236_v12, %v235_v11  ;;  %v352_v25 = vld [vmem:[%s615_s6] ss:$0 sm:$0xff] }
  0x3e   :  { %v354_v29 = vld [vmem:[%s616_s7] ss:$0 sm:$0xff] }
  0x3f   :  { %372 = vmatmul.mubr.msk.f32.vlgmr.msra.gmra.mrb[0].mxu1 %vm80_vm1, %v79_v8  ;;  %400 = vmatpush3.bf16.msra.mxu0 %v399_v13  ;;  %v355_v33 = vld [vmem:[#allocation2] ss:$0 sm:$0xff] }
  0x40   :  { %397 = vmatpush3.bf16.msra.mxu1 %v396_v9  ;;  %378 = vmatprep.mubr.msk.f32.mxu1 %vm488_vm0, %v489_v2 }
  0x41   :  { %401 = vmatprep.subr.bf16.mxu0 %v487_v1 }
  0x43   :  { %379 = vmatmul.mubr.msk.f32.vlgmr.msra.gmra.mrb[2].mxu1 %vm80_vm1, %v78_v10  ;;  %403 = vmatpush3.bf16.msra.mxu0 %v402_v16 }
 0x112   :  { %v150_v17 = vpop.f32.mrb[0].mxu1 }
 0x113   :  { %v373_v18 = vpop.f32.mrb[1].mxu1 }
 0x116   :  { %v223_v20 = vpop.f32.mrb[2].mxu1 }
 0x117   :  { %v224_v21 = vadd.f32 %v223_v20, %v150_v17  ;;  %v380_v22 = vpop.f32.mrb[3].mxu1 }
 0x119   :  { %v233_v23 = vadd.f32 %v351_v19, %v224_v21 }
 0x11b   :  { %v234_v24 = vmax.f32 %v233_v23, 0.0 }
 0x11d   :  { %390 = vmatmul.mubr.msk.f32.vlgmr.msra.gmra.mrb[0].mxu0 %vm246_vm2, %v234_v24 }
 0x1f0   :  { %v316_v26 = vpop.f32.mrb[0].mxu0 }
 0x1f1   :  { %v317_v27 = vadd.f32 %v352_v25, %v316_v26  ;;  %v391_v28 = vpop.f32.mrb[1].mxu0 }
 0x1f3   :  { %v320_v30 = vmax.f32 %v317_v27, 0.0 }
 0x1f5   :  { %v329_v31 = vmul.f32 %v354_v29, %v320_v30 }
 0x1f7   :  { %v331_v32 = vsel %vm330_vm3, %v329_v31, 0.0 }
 0x1f8   :  { %332 = vadd.xlane.f32.xlu0 %v331_v32 }
 0x285   :  { %v333_v34 = vpop.xlane.xlu0 %332 }
 0x286   :  { %v340_v35 = vadd.f32 %v355_v33, %v333_v34 }
 0x288   :  { %342 = vst.msk [vmem:[%s618_s9] sm:$0x3] %vm341_vm4, %v340_v35 }
 0x289   :  { %347 = vsyncpa [#allocation4], 1 }
 0x28a   :  { %348 = vsyncpa [#allocation6], 1 }

</bundles_post_ra>
